<compile_context>
chip_gen: v6e
topology: v6e:2x2x1
jax: 0.10.0
libtpu: 0.0.40
codegen_flags: <defaults>
</compile_context>

<pallas_src>
import functools

import jax
import jax.numpy as jnp
from jax.experimental import pallas as pl
from jax.experimental.pallas import tpu as pltpu


def _cdiv(a, b):
    return -(-a // b)


def _replicate_dma_kernel(src_ref, out_ref, sem, *, chunk_rows, num_full,
                          tail_rows, chunks_per_step):
    """Pure DMA replication of a VMEM-resident constant block into HBM.

    src_ref : (chunk_rows, feat) VMEM block, already replicated to full rows.
    out_ref : (batch, feat) raw HBM ref (memory_space=pl.ANY).
    sem     : DMA semaphores, shape (chunks_per_step,).
    """
    i = pl.program_id(0)

    def full_copy(c, j):
        # Row-slice of the output; the data is contiguous in HBM.
        return pltpu.make_async_copy(
            src_ref,
            out_ref.at[pl.ds(c * chunk_rows, chunk_rows), :],
            sem.at[j],
        )

    def tail_copy(j):
        # Static-size tail (batch % chunk_rows rows) -> no padded output.
        return pltpu.make_async_copy(
            src_ref.at[pl.ds(0, tail_rows), :],
            out_ref.at[pl.ds(num_full * chunk_rows, tail_rows), :],
            sem.at[j],
        )

    # Issue up to `chunks_per_step` DMAs; they drain concurrently.
    for j in range(chunks_per_step):
        c = i * chunks_per_step + j

        @pl.when(c < num_full)
        def _():
            full_copy(c, j).start()

        if tail_rows:
            @pl.when(c == num_full)
            def _():
                tail_copy(j).start()

    # Wait for everything issued this step before leaving it (keeps every
    # grid step self-contained, so the "parallel" axis is megacore-safe).
    for j in range(chunks_per_step):
        c = i * chunks_per_step + j

        @pl.when(c < num_full)
        def _():
            full_copy(c, j).wait()

        if tail_rows:
            @pl.when(c == num_full)
            def _():
                tail_copy(j).wait()


def _choose_layout(batch, feat, itemsize, target_chunk_bytes):
    """Pick (chunk_rows, num_full, tail_rows, chunks_per_step, grid_steps)."""
    sublane = max(8, 32 // max(1, itemsize))       # 8 f32 / 16 bf16 / 32 int8
    row_bytes = max(1, feat * itemsize)
    chunk_rows = max(1, target_chunk_bytes // row_bytes)
    if chunk_rows >= batch:
        chunk_rows = batch
    else:
        chunk_rows = max(sublane, (chunk_rows // sublane) * sublane)
        chunk_rows = min(chunk_rows, batch)

    num_full = batch // chunk_rows
    tail_rows = batch % chunk_rows
    total_dmas = num_full + (1 if tail_rows else 0)

    chunks_per_step = min(4, total_dmas)           # 2-4 in-flight DMAs / step
    steps = _cdiv(total_dmas, chunks_per_step)
    if steps < 2 and total_dmas >= 2:
        # Force >=2 grid steps so v7x megacore can split the writeback.
        chunks_per_step = _cdiv(total_dmas, 2)
        steps = _cdiv(total_dmas, chunks_per_step)
    return chunk_rows, num_full, tail_rows, chunks_per_step, steps


def constant_input_forward(x, const_param, *,
                           min_pallas_bytes=4 * 1024 * 1024,
                           target_chunk_bytes=4 * 1024 * 1024):
    """Replicates ConstantInput.forward.

    x           : any array whose leading dim is the batch size (content unused)
    const_param : (1, C, S, S) learned constant
    returns     : (B, C, S, S) = const_param repeated along batch
    """
    batch = x.shape[0]
    _, c, s, _ = const_param.shape
    feat = c * s * s                               # lane-dense flattened dim
    dtype = const_param.dtype
    itemsize = jnp.dtype(dtype).itemsize

    # Tiny outputs: pallas launch + grid overhead exceeds the copy time;
    # XLA's broadcast already rides the HBM roofline there.
    if batch * feat * itemsize < min_pallas_bytes:
        return jnp.broadcast_to(const_param, (batch, c, s, s))

    chunk_rows, num_full, tail_rows, chunks_per_step, steps = _choose_layout(
        batch, feat, itemsize, target_chunk_bytes)

    # Full-sublane, full-tile source: the kernel does zero vector work.
    # (Cost: one chunk's worth of HBM traffic to materialize it — negligible.)
    src = jnp.broadcast_to(const_param.reshape(1, feat), (chunk_rows, feat))

    kernel = functools.partial(
        _replicate_dma_kernel,
        chunk_rows=chunk_rows, num_full=num_full,
        tail_rows=tail_rows, chunks_per_step=chunks_per_step)

    out_flat = pl.pallas_call(
        kernel,
        out_shape=jax.ShapeDtypeStruct((batch, feat), dtype),
        grid_spec=pltpu.PrefetchScalarGridSpec(
            num_scalar_prefetch=0,
            grid=(steps,),
            in_specs=[
                # Same (full) constant block every step -> VMEM-resident,
                # fetched from HBM once per core.
                pl.BlockSpec((chunk_rows, feat), lambda i: (0, 0)),
            ],
            # Raw HBM output: written only via manual DMA, no VMEM tile.
            out_specs=pl.BlockSpec(memory_space=pl.ANY),
            scratch_shapes=[pltpu.SemaphoreType.DMA((chunks_per_step,))],
        ),
        compiler_params=pltpu.CompilerParams(
            # Each grid step writes a disjoint output slice -> shard across
            # TensorCores on v7x.
            dimension_semantics=("parallel",),
        ),
    )(src)

    return out_flat.reshape(batch, c, s, s)


if __name__ == "__main__":
    key = jax.random.PRNGKey(0)
    k_const, k_x = jax.random.split(key)

    channel = 8
    size = 4
    batch = 2

    # Deterministic "parameter" init (stands in for torch.randn in __init__).
    const_param = jax.random.normal(
        k_const, (1, channel, size, size), dtype=jnp.float32)

    # forward() only uses input.shape[0]; give it a small latent-like tensor.
    x = jax.random.normal(k_x, (batch, 32), dtype=jnp.float32)

    # Force the Pallas DMA path even at this tiny size so the kernel runs.
    out = constant_input_forward(x, const_param, min_pallas_bytes=0)
    out = jax.block_until_ready(out)
    ref = jnp.broadcast_to(const_param, (batch, channel, size, size))
    assert out.shape == (batch, channel, size, size)
    assert jnp.array_equal(out, ref)

    # Second check: exercise multi-step grid + ragged tail chunk
    # (batch=37, chunk_rows=8 -> 4 full chunks + 5-row tail over 2 grid steps).
    batch2 = 37
    x2 = jax.random.normal(k_x, (batch2, 32), dtype=jnp.float32)
    out2 = constant_input_forward(
        x2, const_param, min_pallas_bytes=0, target_chunk_bytes=4096)
    out2 = jax.block_until_ready(out2)
    ref2 = jnp.broadcast_to(const_param, (batch2, channel, size, size))
    assert jnp.array_equal(out2, ref2)

    print("KERNEL_OK")
</pallas_src>

<mosaic_0001>
module attributes {stable_mosaic.version = 11 : i64} {
  func.func @_replicate_dma_kernel(%arg0: i32, %arg1: memref<2x128xf32, #tpu.memory_space<vmem>>, %arg2: memref<2x128xf32, #tpu.memory_space<any>>, %arg3: memref<1x!tpu.dma_semaphore, #tpu.memory_space<semaphore_mem>>) attributes {dimension_semantics = [#tpu.dimension_semantics<parallel>], iteration_bounds = array<i64: 1>, scalar_prefetch = 0 : i64, scratch_operands = 1 : i64, tpu.core_type = #tpu.core_type<tc>, window_params = [{pipeline_mode = #tpu.pipeline_mode<synchronous>, transform_indices = @transform_0, window_bounds = array<i64: 2, 128>}, {}]} {
    %c1_i32 = arith.constant 1 : i32
    %0 = arith.muli %arg0, %c1_i32 : i32
    %c0_i32 = arith.constant 0 : i32
    %1 = arith.addi %0, %c0_i32 : i32
    %c1_i32_0 = arith.constant 1 : i32
    %2 = arith.cmpi slt, %1, %c1_i32_0 : i32
    %3 = arith.extui %2 : i1 to i32
    %c0_i32_1 = arith.constant 0 : i32
    %4 = arith.cmpi ne, %3, %c0_i32_1 : i32
    scf.if %4 {
      %c2_i32 = arith.constant 2 : i32
      %10 = arith.muli %1, %c2_i32 : i32
      %c0_i32_6 = arith.constant 0 : i32
      %c0_i32_7 = arith.constant 0 : i32
      %11 = tpu.memref_slice %arg2[%10, %c0_i32_7] : memref<2x128xf32, #tpu.memory_space<any>> -> memref<2x128xf32, #tpu.memory_space<any>>
      %12 = tpu.memref_slice %arg3[%c0_i32_6] : memref<1x!tpu.dma_semaphore, #tpu.memory_space<semaphore_mem>> -> memref<1x!tpu.dma_semaphore, #tpu.memory_space<semaphore_mem>>
      %13 = tpu.memref_squeeze %12 : memref<1x!tpu.dma_semaphore, #tpu.memory_space<semaphore_mem>> -> memref<!tpu.dma_semaphore, #tpu.memory_space<semaphore_mem>>
      tpu.enqueue_dma source(%arg1 : memref<2x128xf32, #tpu.memory_space<vmem>>) target(%11 : memref<2x128xf32, #tpu.memory_space<any>>) target_semaphore(%13 : memref<!tpu.dma_semaphore, #tpu.memory_space<semaphore_mem>>)
    } else {
    }
    %c1_i32_2 = arith.constant 1 : i32
    %5 = arith.muli %arg0, %c1_i32_2 : i32
    %c0_i32_3 = arith.constant 0 : i32
    %6 = arith.addi %5, %c0_i32_3 : i32
    %c1_i32_4 = arith.constant 1 : i32
    %7 = arith.cmpi slt, %6, %c1_i32_4 : i32
    %8 = arith.extui %7 : i1 to i32
    %c0_i32_5 = arith.constant 0 : i32
    %9 = arith.cmpi ne, %8, %c0_i32_5 : i32
    scf.if %9 {
      %c2_i32 = arith.constant 2 : i32
      %10 = arith.muli %6, %c2_i32 : i32
      %c0_i32_6 = arith.constant 0 : i32
      %c0_i32_7 = arith.constant 0 : i32
      %11 = tpu.memref_slice %arg2[%10, %c0_i32_7] : memref<2x128xf32, #tpu.memory_space<any>> -> memref<2x128xf32, #tpu.memory_space<any>>
      %12 = tpu.memref_slice %arg3[%c0_i32_6] : memref<1x!tpu.dma_semaphore, #tpu.memory_space<semaphore_mem>> -> memref<1x!tpu.dma_semaphore, #tpu.memory_space<semaphore_mem>>
      %13 = tpu.memref_squeeze %12 : memref<1x!tpu.dma_semaphore, #tpu.memory_space<semaphore_mem>> -> memref<!tpu.dma_semaphore, #tpu.memory_space<semaphore_mem>>
      tpu.wait_dma2 semaphore(%13 : memref<!tpu.dma_semaphore, #tpu.memory_space<semaphore_mem>>) src(%arg1 : memref<2x128xf32, #tpu.memory_space<vmem>>) dst(%11 : memref<2x128xf32, #tpu.memory_space<any>>)
    } else {
    }
    return
  }
  func.func @transform_0(%arg0: i32) -> (i32, i32) {
    %c0_i32 = arith.constant 0 : i32
    %c0_i32_0 = arith.constant 0 : i32
    %c0_i32_1 = arith.constant 0 : i32
    return %c0_i32, %c0_i32_0 : i32, i32
  }
}

</mosaic_0001>

<bundles_post_ra>
// kernel: tpu_custom_call.1
= control target key start
LH: loop header
LB: loop body
LE: loop exit
PB: predicated region body
PF: predicated region fallthrough
CT: control target
= control target key end

     0   :  { %6 = vsyncpa [#allocation4], 0  ;;  %s94_s6 = smov [#allocation3]   ;;  %s111_s0 = inlined_call_operand.hbm [shape: f32[2,128], index: 0, kind: input, shape index: {}]   ;;  %s112_s1 = inlined_call_operand.hbm [shape: f32[2,128], index: 1, kind: output, shape index: {}]  }
   0x1   :  { %s13_s7 = sshll.u32 %s94_s6, 4  ;;  %s14_s7 = int_to_ptr.vmem [resolvable:$true] %s13_s7 }
   0x2   :  { %s58_s8 = scalar_lea.vmem %s14_s7, 32  ;;  %p63_p1 = scmp.lt.s32.totalorder %s14_s7, %s14_s7 }
   0x3   :  { %p59_p0 = scmp.ne.s32.totalorder %s14_s7, %s58_s8  ;;  %p64_p2 = scmp.lt.s32.totalorder %s58_s8, %s58_s8 }
   0x5   :  { %p65_p3 = por %p64_p2, %p63_p1 }
   0x7   :  { %p66_p4 = pnand %p65_p3, %p59_p0 }
   0x9   :  { %69 = shalt.err (!%p66_p4)
}
   0xa   :  { %16 = dma.hbm_to_vmem [thread:$0]  %s111_s0, 32, %s14_s7, [#allocation4]  }
   0xb   :  { %90 = dma.done.wait [#allocation4], 32  }
   0xc   :  { %91 = vsyncadd [#allocation4], 4294967264 }
   0xd   :  { %81 = shalt.err (!%p66_p4)  }
   0xe   :  { %37 = dma.vmem_to_hbm [thread:$0]  %s14_s7, 32, %s112_s1, [#allocation2] }
   0xf   :  { %92 = dma.done.wait [#allocation2], 32 }
  0x10   :  { %93 = vsyncadd [#allocation2], 4294967264 }
  0x11   :  { %41 = vsyncpa [#allocation4], 1 }
  0x12   :  { %42 = vsyncmov [#allocation2] }
  0x15   :  { %s43_s13 = vpop.sfrf %42 }
  0x16   :  { %p48_p5 = scmp.ne.s32.totalorder %s43_s13, 0 }
  0x18   :  { %47 = shalt.err (%p48_p5)  }

</bundles_post_ra>
